<compile_context>
chip_gen: v6e
topology: v6e:2x2x1
jax: 0.10.0
libtpu: 0.0.40
codegen_flags: <defaults>
</compile_context>

<pallas_src>
import math
import functools

import jax
import jax.numpy as jnp
from jax import lax
from jax.experimental import pallas as pl
from jax.experimental.pallas import tpu as pltpu


def _vmem_budget_bytes():
    """~75% of this generation's VMEM (v5e/v6e: 128 MiB, v7x: 64 MiB)."""
    cap = 64 * 1024 * 1024  # safe fallback (v7x physical VMEM)
    try:
        cap = int(pltpu.get_tpu_info().vmem_capacity_bytes)
    except Exception:
        pass
    return max(32 * 1024 * 1024, (cap * 3) // 4)


_VMEM_LIMIT = _vmem_budget_bytes()


def _pick_tile(dim, target):
    """Largest tile <= target dividing dim; prefers x128, then x8 tiles."""
    if dim <= target:
        return dim
    for step in (128, 8):
        t = (target // step) * step
        while t >= step:
            if dim % t == 0:
                return t
            t -= step
    # TODO(synk): pad + masked tail tiles instead of a full-dim block for
    # awkward (e.g. prime) dims; full-dim fallback is correct but VMEM-hungry.
    return dim


# ---------------------------------------------------------------------------
# Kernel 1: generic tiled dense layer  y = x @ W + b  (used for out projection)
# ---------------------------------------------------------------------------
def _linear_kernel(x_ref, w_ref, b_ref, o_ref, acc_ref):
    k = pl.program_id(2)

    @pl.when(k == 0)
    def _():
        acc_ref[...] = jnp.zeros_like(acc_ref)

    acc_ref[...] += jnp.dot(
        x_ref[...].astype(w_ref.dtype), w_ref[...],
        preferred_element_type=jnp.float32,
    )

    @pl.when(k == pl.num_programs(2) - 1)
    def _():
        o_ref[...] = (acc_ref[...] + b_ref[...]).astype(o_ref.dtype)


def pallas_linear(x2d, w, b, *, out_dtype=jnp.float32, tm=512, tn=512, tk=1024):
    """x2d: [M, K], w: [K, N] (bf16 stored), b: [N] -> [M, N] (f32 accum)."""
    M, K = x2d.shape
    K2, N = w.shape
    assert K == K2
    tm = _pick_tile(M, tm)
    tn = _pick_tile(N, tn)
    tk = _pick_tile(K, tk)
    grid = (M // tm, N // tn, K // tk)
    b2d = b.reshape(1, N).astype(jnp.float32)

    return pl.pallas_call(
        _linear_kernel,
        out_shape=jax.ShapeDtypeStruct((M, N), out_dtype),
        grid_spec=pltpu.PrefetchScalarGridSpec(
            num_scalar_prefetch=0,
            grid=grid,
            in_specs=[
                pl.BlockSpec((tm, tk), lambda i, j, k: (i, k)),
                pl.BlockSpec((tk, tn), lambda i, j, k: (k, j)),
                pl.BlockSpec((1, tn), lambda i, j, k: (0, j)),
            ],
            out_specs=pl.BlockSpec((tm, tn), lambda i, j, k: (i, j)),
            scratch_shapes=[pltpu.VMEM((tm, tn), jnp.float32)],
        ),
        compiler_params=pltpu.CompilerParams(
            dimension_semantics=("parallel", "parallel", "arbitrary"),
            vmem_limit_bytes=_VMEM_LIMIT,
        ),
    )(x2d, w, b2d)


# ---------------------------------------------------------------------------
# Kernel 2: fused QKV projection emitting q/k/v in [B, H, S, hd] directly
# ---------------------------------------------------------------------------
def _qkv_kernel(x_ref, w_ref, b_ref, q_ref, k_ref, v_ref, acc_ref, *, head_dim):
    kk = pl.program_id(3)

    @pl.when(kk == 0)
    def _():
        acc_ref[...] = jnp.zeros_like(acc_ref)

    acc_ref[...] += jnp.dot(
        x_ref[0].astype(w_ref.dtype), w_ref[0],
        preferred_element_type=jnp.float32,
    )

    @pl.when(kk == pl.num_programs(3) - 1)
    def _():
        y = acc_ref[...] + b_ref[0]                       # (tm, 3*hd) f32
        q_ref[0, 0] = y[:, :head_dim].astype(q_ref.dtype)
        k_ref[0, 0] = y[:, head_dim:2 * head_dim].astype(k_ref.dtype)
        v_ref[0, 0] = y[:, 2 * head_dim:].astype(v_ref.dtype)


def pallas_qkv_projection(x, w_heads, b_heads, *, out_dtype=jnp.bfloat16,
                          tm=512, tk=1024):
    """x: [B,S,D], w_heads: [H,D,3*hd] (bf16, Q-scale folded), b_heads: [H,1,3*hd].
    Returns q, k, v each [B,H,S,hd] — no HBM transpose round trip."""
    B, S, D = x.shape
    H, D2, thd = w_heads.shape
    assert D == D2
    hd = thd // 3
    tm = _pick_tile(S, tm)
    tk = _pick_tile(D, tk)
    grid = (B, S // tm, H, D // tk)
    kernel = functools.partial(_qkv_kernel, head_dim=hd)
    out_sds = jax.ShapeDtypeStruct((B, H, S, hd), out_dtype)
    out_spec = pl.BlockSpec((1, 1, tm, hd), lambda b, s, h, k: (b, h, s, 0))

    return pl.pallas_call(
        kernel,
        out_shape=(out_sds, out_sds, out_sds),
        grid_spec=pltpu.PrefetchScalarGridSpec(
            num_scalar_prefetch=0,
            grid=grid,
            in_specs=[
                pl.BlockSpec((1, tm, tk), lambda b, s, h, k: (b, s, k)),
                pl.BlockSpec((1, tk, thd), lambda b, s, h, k: (h, k, 0)),
                pl.BlockSpec((1, 1, thd), lambda b, s, h, k: (h, 0, 0)),
            ],
            out_specs=[out_spec, out_spec, out_spec],
            scratch_shapes=[pltpu.VMEM((tm, thd), jnp.float32)],
        ),
        compiler_params=pltpu.CompilerParams(
            dimension_semantics=("parallel", "parallel", "parallel", "arbitrary"),
            vmem_limit_bytes=_VMEM_LIMIT,
        ),
    )(x, w_heads, b_heads)


# ---------------------------------------------------------------------------
# Kernel 3: scaled dot-product attention, tiled over query rows per (B, H)
# ---------------------------------------------------------------------------
def _attention_kernel(q_ref, k_ref, v_ref, o_ref, attn_ref, *, num_heads, scramble):
    # 1/sqrt(head_dim) is already folded into the Q projection weights.
    q = q_ref[0, 0]                    # [tq, hd] bf16
    k = k_ref[0, 0]                    # [S,  hd] bf16
    v = v_ref[0, 0]                    # [S,  hd] bf16

    # Contract both last dims on the MXU — no k.T relayout.
    s = lax.dot_general(
        q, k, dimension_numbers=(((1,), (1,)), ((), ())),
        preferred_element_type=jnp.float32,
    )                                  # [tq, S] f32

    # Numerically stable softmax in f32; exact reciprocal so the RETURNED
    # attention rows sum to 1 (matches F.softmax).
    m = jnp.max(s, axis=-1, keepdims=True)
    e = jnp.exp(s - m)
    inv = pl.reciprocal(jnp.sum(e, axis=-1, keepdims=True))
    p = e * inv

    attn_ref[0, 0] = p.astype(attn_ref.dtype)     # lane-dense (last dim S)
    o = jnp.dot(p.astype(v.dtype), v, preferred_element_type=jnp.float32)
    if scramble:
        tq, hd = o.shape
        # Write straight into the torch-reshape ("scrambled") [B, S, D] layout so
        # the store is lane-dense (last dim = D) even when hd < 128.
        o_ref[0] = o.reshape(tq // num_heads, num_heads * hd).astype(o_ref.dtype)
    else:
        o_ref[0, 0] = o.astype(o_ref.dtype)


def _attn_q_tile(S, hd, budget):
    """q-row tile sized so the per-step working set stays inside the VMEM budget."""
    kv_bytes = 2 * 2 * S * hd * 2           # K + V blocks, bf16, double-buffered
    target = 512
    while target > 16:
        work = kv_bytes + 6 * target * S * 4 + 4 * target * hd * 8
        if work <= 0.7 * budget:
            break
        target //= 2
    return _pick_tile(S, max(target, 8))


def pallas_attention(q, k, v):
    """q,k,v: [B,H,S,hd] -> (values, attention [B,H,S,S] f32).

    values is [B,S,D] (already in the module's scrambled reshape layout) when the
    tile geometry allows lane-dense stores, otherwise [B,H,S,hd]."""
    B, H, S, hd = q.shape
    D = H * hd
    tq = _attn_q_tile(S, hd, _VMEM_LIMIT)
    scramble = (S % H == 0) and (tq % H == 0) and ((tq // H) % 8 == 0 or tq // H == S)

    kernel = functools.partial(_attention_kernel, num_heads=H, scramble=scramble)
    if scramble:
        values_shape = jax.ShapeDtypeStruct((B, S, D), q.dtype)
        values_spec = pl.BlockSpec(
            (1, tq // H, D), lambda b, h, i: (b, h * (S // tq) + i, 0))
    else:
        values_shape = jax.ShapeDtypeStruct((B, H, S, hd), q.dtype)
        values_spec = pl.BlockSpec((1, 1, tq, hd), lambda b, h, i: (b, h, i, 0))

    return pl.pallas_call(
        kernel,
        out_shape=(
            values_shape,
            jax.ShapeDtypeStruct((B, H, S, S), jnp.float32),   # returned attn probs
        ),
        grid_spec=pltpu.PrefetchScalarGridSpec(
            num_scalar_prefetch=0,
            grid=(B, H, S // tq),
            in_specs=[
                pl.BlockSpec((1, 1, tq, hd), lambda b, h, i: (b, h, i, 0)),
                pl.BlockSpec((1, 1, S, hd), lambda b, h, i: (b, h, 0, 0)),
                pl.BlockSpec((1, 1, S, hd), lambda b, h, i: (b, h, 0, 0)),
            ],
            out_specs=[
                values_spec,
                pl.BlockSpec((1, 1, tq, S), lambda b, h, i: (b, h, i, 0)),
            ],
        ),
        compiler_params=pltpu.CompilerParams(
            # TODO(synk): on v7x an explicit CORE_PARALLEL leading axis would
            # guarantee the 2-TensorCore split; "parallel" lets Mosaic choose.
            dimension_semantics=("parallel", "parallel", "parallel"),
            vmem_limit_bytes=_VMEM_LIMIT,
        ),
    )(q, k, v)


# ---------------------------------------------------------------------------
# Module wrapper (one-time parameter prep + free reshapes stay in plain JAX)
# ---------------------------------------------------------------------------
class MultiheadAttentionPallas:
    def __init__(self, d_model, num_heads, key, compute_dtype=jnp.bfloat16):
        assert d_model % num_heads == 0
        self.d_model = d_model
        self.num_heads = num_heads
        self.head_dim = d_model // num_heads
        self.compute_dtype = compute_dtype
        H, hd, D = num_heads, self.head_dim, d_model

        k1, k2, k3, k4 = jax.random.split(key, 4)
        # nn.Linear default init: U(-1/sqrt(fan_in), 1/sqrt(fan_in)); stored as
        # [in, out] so the kernels compute x @ W + b directly.
        bound = 1.0 / math.sqrt(D)
        self.w_qkv = jax.random.uniform(k1, (D, 3 * D), jnp.float32, -bound, bound)
        self.b_qkv = jax.random.uniform(k2, (3 * D,), jnp.float32, -bound, bound)
        self.w_out = jax.random.uniform(k3, (D, D), jnp.float32, -bound, bound)
        self.b_out = jax.random.uniform(k4, (D,), jnp.float32, -bound, bound)

        # Kernel-side parameters, prepared ONCE:
        #  * fold 1/sqrt(hd) into the Q columns (f32) -> no per-tile scale mul,
        #    no extra bf16 rounding of Q.
        #  * store weights bf16, per-head [H, D, 3*hd] -> no per-call cast pass
        #    and the QKV GEMM can emit [B, H, S, hd] directly.
        col = jnp.arange(3 * D)
        qscale = jnp.where((col % (3 * hd)) < hd, 1.0 / math.sqrt(hd), 1.0)
        w_scaled = self.w_qkv * qscale[None, :]
        b_scaled = self.b_qkv * qscale
        self.w_qkv_heads = jnp.transpose(
            w_scaled.reshape(D, H, 3 * hd), (1, 0, 2)).astype(compute_dtype)
        self.b_qkv_heads = b_scaled.reshape(H, 1, 3 * hd).astype(jnp.float32)
        self.w_out_c = self.w_out.astype(compute_dtype)

    def __call__(self, x, mask=None):
        # TODO(synk): only mask=None (the module's default call) is supported; an
        # additive mask would be passed as one extra [S, S] kernel input.
        B, S, D = x.shape
        H, hd = self.num_heads, self.head_dim

        # Fused QKV projection: q/k/v come back already as [B, H, S, hd] bf16.
        q, k, v = pallas_qkv_projection(x, self.w_qkv_heads, self.b_qkv_heads,
                                        out_dtype=self.compute_dtype)

        values, attention = pallas_attention(q, k, v)

        # Reproduce the PyTorch reshape EXACTLY (no head transpose back).  When
        # the attention kernel already emitted the scrambled [B, S, D] layout
        # this reshape is free; otherwise it is the same row-major reshape.
        values2d = values.reshape(B * S, H * hd)

        out = pallas_linear(values2d, self.w_out_c, self.b_out,
                            out_dtype=jnp.float32)
        return out.reshape(B, S, D), attention


# ---------------------------------------------------------------------------
# Pure-JAX (float32) reference for validation
# ---------------------------------------------------------------------------
def reference_forward(mod, x):
    B, S, D = x.shape
    H, hd = mod.num_heads, mod.head_dim
    qkv = x.reshape(B * S, D) @ mod.w_qkv + mod.b_qkv
    qkv = qkv.reshape(B, S, H, 3 * hd).transpose(0, 2, 1, 3)
    q, k, v = jnp.split(qkv, 3, axis=-1)
    scaled = jnp.einsum("bhqd,bhkd->bhqk", q, k) / math.sqrt(hd)
    attn = jax.nn.softmax(scaled, axis=-1)
    vals = jnp.einsum("bhqk,bhkd->bhqd", attn, v)
    vals = vals.reshape(B * S, H * hd)
    out = (vals @ mod.w_out + mod.b_out).reshape(B, S, D)
    return out, attn


if __name__ == "__main__":
    key = jax.random.PRNGKey(0)
    k_param, k_x = jax.random.split(key)

    B, S, d_model, num_heads = 2, 8, 32, 4
    mod = MultiheadAttentionPallas(d_model, num_heads, k_param)
    x = jax.random.normal(k_x, (B, S, d_model), dtype=jnp.float32)

    out, attn = mod(x)
    jax.block_until_ready((out, attn))

    out_ref, attn_ref = reference_forward(mod, x)
    assert out.shape == (B, S, d_model)
    assert attn.shape == (B, num_heads, S, S)
    # bf16 MXU inputs => relaxed tolerance vs the f32 reference.
    assert jnp.allclose(out, out_ref, atol=5e-2, rtol=5e-2)
    assert jnp.allclose(attn, attn_ref, atol=5e-2, rtol=5e-2)

    print("KERNEL_OK")
</pallas_src>

<mosaic_0001>
module attributes {stable_mosaic.version = 11 : i64} {
  func.func @_qkv_kernel(%arg0: i32, %arg1: i32, %arg2: i32, %arg3: i32, %arg4: memref<1x8x32xf32, #tpu.memory_space<vmem>>, %arg5: memref<1x32x24xbf16, #tpu.memory_space<vmem>>, %arg6: memref<1x1x24xf32, #tpu.memory_space<vmem>>, %arg7: memref<1x1x8x8xbf16, #tpu.memory_space<vmem>>, %arg8: memref<1x1x8x8xbf16, #tpu.memory_space<vmem>>, %arg9: memref<1x1x8x8xbf16, #tpu.memory_space<vmem>>, %arg10: memref<8x24xf32, #tpu.memory_space<vmem>>) attributes {dimension_semantics = [#tpu.dimension_semantics<parallel>, #tpu.dimension_semantics<parallel>, #tpu.dimension_semantics<parallel>, #tpu.dimension_semantics<arbitrary>], iteration_bounds = array<i64: 2, 1, 4, 1>, scalar_prefetch = 0 : i64, scratch_operands = 1 : i64, tpu.core_type = #tpu.core_type<tc>, window_params = [{transform_indices = @transform_0, window_bounds = array<i64: 1, 8, 32>}, {transform_indices = @transform_1, window_bounds = array<i64: 1, 32, 24>}, {transform_indices = @transform_2, window_bounds = array<i64: 1, 1, 24>}, {transform_indices = @transform_3, window_bounds = array<i64: 1, 1, 8, 8>}, {transform_indices = @transform_4, window_bounds = array<i64: 1, 1, 8, 8>}, {transform_indices = @transform_5, window_bounds = array<i64: 1, 1, 8, 8>}]} {
    %c0_i32 = arith.constant 0 : i32
    %0 = arith.cmpi eq, %arg3, %c0_i32 : i32
    %1 = arith.extui %0 : i1 to i32
    %c0_i32_0 = arith.constant 0 : i32
    %2 = arith.cmpi ne, %1, %c0_i32_0 : i32
    scf.if %2 {
      %cst_12 = arith.constant 0.000000e+00 : f32
      %15 = vector.broadcast %cst_12 : f32 to vector<8x24xf32>
      %c0_13 = arith.constant 0 : index
      %c0_14 = arith.constant 0 : index
      %16 = vector.load %arg10[%c0_13, %c0_14] : memref<8x24xf32, #tpu.memory_space<vmem>>, vector<8x24xf32>
      tpu.vector_store %arg10[%c0_13, %c0_14], %15 {strides = array<i32>} : memref<8x24xf32, #tpu.memory_space<vmem>>, vector<8x24xf32>,
    } else {
    }
    %c0 = arith.constant 0 : index
    %c0_1 = arith.constant 0 : index
    %3 = vector.load %arg10[%c0, %c0_1] : memref<8x24xf32, #tpu.memory_space<vmem>>, vector<8x24xf32>
    %c0_2 = arith.constant 0 : index
    %c0_3 = arith.constant 0 : index
    %c0_4 = arith.constant 0 : index
    %4 = vector.load %arg4[%c0_2, %c0_3, %c0_4] : memref<1x8x32xf32, #tpu.memory_space<vmem>>, vector<1x8x32xf32>
    %5 = vector.shape_cast %4 : vector<1x8x32xf32> to vector<8x32xf32>
    %6 = arith.truncf %5 : vector<8x32xf32> to vector<8x32xbf16>
    %c0_5 = arith.constant 0 : index
    %c0_6 = arith.constant 0 : index
    %c0_7 = arith.constant 0 : index
    %7 = vector.load %arg5[%c0_5, %c0_6, %c0_7] : memref<1x32x24xbf16, #tpu.memory_space<vmem>>, vector<1x32x24xbf16>
    %8 = vector.shape_cast %7 : vector<1x32x24xbf16> to vector<32x24xbf16>
    %cst = arith.constant dense<0.000000e+00> : vector<8x24xf32>
    %9 = tpu.matmul %6, %8, %cst {dimension_numbers = #tpu.dot_dimension_numbers<[1], [0], [0], [1], [0, 0, 1, 1], [], []>} : vector<8x32xbf16>, vector<32x24xbf16>, vector<8x24xf32> -> vector<8x24xf32>
    %10 = arith.addf %3, %9 : vector<8x24xf32>
    %c0_8 = arith.constant 0 : index
    %c0_9 = arith.constant 0 : index
    %11 = vector.load %arg10[%c0_8, %c0_9] : memref<8x24xf32, #tpu.memory_space<vmem>>, vector<8x24xf32>
    tpu.vector_store %arg10[%c0_8, %c0_9], %10 {strides = array<i32>} : memref<8x24xf32, #tpu.memory_space<vmem>>, vector<8x24xf32>,
    %c0_i32_10 = arith.constant 0 : i32
    %12 = arith.cmpi eq, %arg3, %c0_i32_10 : i32
    %13 = arith.extui %12 : i1 to i32
    %c0_i32_11 = arith.constant 0 : i32
    %14 = arith.cmpi ne, %13, %c0_i32_11 : i32
    scf.if %14 {
      %c0_12 = arith.constant 0 : index
      %c0_13 = arith.constant 0 : index
      %15 = vector.load %arg10[%c0_12, %c0_13] : memref<8x24xf32, #tpu.memory_space<vmem>>, vector<8x24xf32>
      %c0_14 = arith.constant 0 : index
      %c0_15 = arith.constant 0 : index
      %c0_16 = arith.constant 0 : index
      %16 = vector.load %arg6[%c0_14, %c0_15, %c0_16] : memref<1x1x24xf32, #tpu.memory_space<vmem>>, vector<1x1x24xf32>
      %17 = vector.shape_cast %16 : vector<1x1x24xf32> to vector<1x24xf32>
      %18 = vector.broadcast %17 : vector<1x24xf32> to vector<8x24xf32>
      %19 = arith.addf %15, %18 : vector<8x24xf32>
      %20 = vector.extract_strided_slice %19 {offsets = [0, 0], sizes = [8, 8], strides = [1, 1]} : vector<8x24xf32> to vector<8x8xf32>
      %21 = arith.truncf %20 : vector<8x8xf32> to vector<8x8xbf16>
      %c0_17 = arith.constant 0 : index
      %c0_18 = arith.constant 0 : index
      %c0_19 = arith.constant 0 : index
      %c0_20 = arith.constant 0 : index
      %22 = vector.load %arg7[%c0_17, %c0_18, %c0_19, %c0_20] : memref<1x1x8x8xbf16, #tpu.memory_space<vmem>>, vector<1x1x8x8xbf16>
      %23 = vector.shape_cast %22 : vector<1x1x8x8xbf16> to vector<8x8xbf16>
      %24 = vector.shape_cast %21 : vector<8x8xbf16> to vector<1x1x8x8xbf16>
      tpu.vector_store %arg7[%c0_17, %c0_18, %c0_19, %c0_20], %24 {strides = array<i32>} : memref<1x1x8x8xbf16, #tpu.memory_space<vmem>>, vector<1x1x8x8xbf16>,
      %25 = vector.extract_strided_slice %19 {offsets = [0, 8], sizes = [8, 8], strides = [1, 1]} : vector<8x24xf32> to vector<8x8xf32>
      %26 = arith.truncf %25 : vector<8x8xf32> to vector<8x8xbf16>
      %c0_21 = arith.constant 0 : index
      %c0_22 = arith.constant 0 : index
      %c0_23 = arith.constant 0 : index
      %c0_24 = arith.constant 0 : index
      %27 = vector.load %arg8[%c0_21, %c0_22, %c0_23, %c0_24] : memref<1x1x8x8xbf16, #tpu.memory_space<vmem>>, vector<1x1x8x8xbf16>
      %28 = vector.shape_cast %27 : vector<1x1x8x8xbf16> to vector<8x8xbf16>
      %29 = vector.shape_cast %26 : vector<8x8xbf16> to vector<1x1x8x8xbf16>
      tpu.vector_store %arg8[%c0_21, %c0_22, %c0_23, %c0_24], %29 {strides = array<i32>} : memref<1x1x8x8xbf16, #tpu.memory_space<vmem>>, vector<1x1x8x8xbf16>,
      %30 = vector.extract_strided_slice %19 {offsets = [0, 16], sizes = [8, 8], strides = [1, 1]} : vector<8x24xf32> to vector<8x8xf32>
      %31 = arith.truncf %30 : vector<8x8xf32> to vector<8x8xbf16>
      %c0_25 = arith.constant 0 : index
      %c0_26 = arith.constant 0 : index
      %c0_27 = arith.constant 0 : index
      %c0_28 = arith.constant 0 : index
      %32 = vector.load %arg9[%c0_25, %c0_26, %c0_27, %c0_28] : memref<1x1x8x8xbf16, #tpu.memory_space<vmem>>, vector<1x1x8x8xbf16>
      %33 = vector.shape_cast %32 : vector<1x1x8x8xbf16> to vector<8x8xbf16>
      %34 = vector.shape_cast %31 : vector<8x8xbf16> to vector<1x1x8x8xbf16>
      tpu.vector_store %arg9[%c0_25, %c0_26, %c0_27, %c0_28], %34 {strides = array<i32>} : memref<1x1x8x8xbf16, #tpu.memory_space<vmem>>, vector<1x1x8x8xbf16>,
    } else {
    }
    return
  }
  func.func @transform_0(%arg0: i32, %arg1: i32, %arg2: i32, %arg3: i32) -> (i32, i32, i32) {
    %c0_i32 = arith.constant 0 : i32
    return %arg0, %arg1, %arg3 : i32, i32, i32
  }
  func.func @transform_1(%arg0: i32, %arg1: i32, %arg2: i32, %arg3: i32) -> (i32, i32, i32) {
    %c0_i32 = arith.constant 0 : i32
    %c0_i32_0 = arith.constant 0 : i32
    return %arg2, %arg3, %c0_i32 : i32, i32, i32
  }
  func.func @transform_2(%arg0: i32, %arg1: i32, %arg2: i32, %arg3: i32) -> (i32, i32, i32) {
    %c0_i32 = arith.constant 0 : i32
    %c0_i32_0 = arith.constant 0 : i32
    %c0_i32_1 = arith.constant 0 : i32
    return %arg2, %c0_i32, %c0_i32_0 : i32, i32, i32
  }
  func.func @transform_3(%arg0: i32, %arg1: i32, %arg2: i32, %arg3: i32) -> (i32, i32, i32, i32) {
    %c0_i32 = arith.constant 0 : i32
    %c0_i32_0 = arith.constant 0 : i32
    return %arg0, %arg2, %arg1, %c0_i32 : i32, i32, i32, i32
  }
  func.func @transform_4(%arg0: i32, %arg1: i32, %arg2: i32, %arg3: i32) -> (i32, i32, i32, i32) {
    %c0_i32 = arith.constant 0 : i32
    %c0_i32_0 = arith.constant 0 : i32
    return %arg0, %arg2, %arg1, %c0_i32 : i32, i32, i32, i32
  }
  func.func @transform_5(%arg0: i32, %arg1: i32, %arg2: i32, %arg3: i32) -> (i32, i32, i32, i32) {
    %c0_i32 = arith.constant 0 : i32
    %c0_i32_0 = arith.constant 0 : i32
    return %arg0, %arg2, %arg1, %c0_i32 : i32, i32, i32, i32
  }
}

</mosaic_0001>

<bundles_post_ra>
// kernel: tpu_custom_call.1
= control target key start
LH: loop header
LB: loop body
LE: loop exit
PB: predicated region body
PF: predicated region fallthrough
CT: control target
= control target key end

     0   :  { %s1217_s0 = inlined_call_operand.vmem [shape: f32[2,8,32], index: 0, kind: input, shape index: {}]   ;;  %s1218_s1 = inlined_call_operand.vmem [shape: bf16[4,32,24], index: 1, kind: input, shape index: {}]   ;;  %s1219_s2 = inlined_call_operand.vmem [shape: f32[4,1,24], index: 2, kind: input, shape index: {}]   ;;  %s1220_s3 = inlined_call_operand.hbm [shape: bf16[2,4,8,8], index: 3, kind: output, shape index: {0}]   ;;  %s1221_s4 = inlined_call_operand.hbm [shape: bf16[2,4,8,8], index: 4, kind: output, shape index: {1}]   ;;  %s1222_s5 = inlined_call_operand.hbm [shape: bf16[2,4,8,8], index: 5, kind: output, shape index: {2}]  }
   0x1   :  { %1226 = sst [smem:[#allocation10_spill]] %s1217_s0 }
   0x2   :  { %11 = vsyncpa [#allocation4], 0 }
   0x3   :  { %13 = vsyncpa [#allocation4 + $0x1], 0 }
   0x4   :  { %14 = vsyncpa [#allocation6], 0 }
   0x5   :  { %16 = vsyncpa [#allocation6 + $0x1], 0  ;;  %s999_s18 = smov 0   ;;  %s1001_s19 = smov 0  }
   0x6   :  { %s1003_s20 = smov 0   ;;  %s1005_s21 = smov 0  }
   0x7   :  { %s1007_s22 = smov 0   ;;  %s1009_s23 = smov 0  }
   0x8   :  { %s1011_s24 = smov 0   ;;  %s1013_s25 = smov 0  }
   0x9 LB: > { %s1224_s26 = sadd.s32 4294967295, %s960_s25   ;;  %s1223_s27 = sadd.s32 4294967294, %s960_s25   ;;  %s960_s25 = sphi %s1013_s25, %s22_s25   ;;  %s956_s24 = sphi %s1011_s24, %s1241_s24   ;;  %s952_s23 = sphi %s1009_s23, %s1240_s23   ;;  %s948_s22 = sphi %s1007_s22, %s1239_s22   ;;  %s944_s21 = sphi %s1005_s21, %s1238_s21   ;;  %s940_s20 = sphi %s1003_s20, %s1237_s20   ;;  %s936_s19 = sphi %s1001_s19, %s1236_s19   ;;  %s932_s18 = sphi %s999_s18, %s1235_s18  }
   0xa   : > { %s40_s28 = sadd.s32 1, %s952_s23  ;;  %s48_s29 = sadd.s32 1, %s956_s24 }
   0xb   : > { %p42_p0 = scmp.ge.s32.totalorder %s40_s28, 4  ;;  %p153_p1 = scmp.ne.s32.totalorder %s940_s20, %s936_s19 }
   0xc   : > { %p154_p2 = scmp.eq.s32.totalorder %s1224_s26, 7  ;;  %p159_p5 = scmp.ne.s32.totalorder %s936_s19, %s932_s18 }
   0xd   : > { %s1243_s28 = smov (%p42_p0, %s40_s28), 0  ;;  %s1245_s29 = smov (!%p42_p0, %s48_s29), %s956_s24 }
   0xe   : > { %s137_s30 = ssub.s32 %s952_s23, %s1243_s28  ;;  %p1052_p3 = por %p154_p2, %p153_p1 }
   0xf   : > { %p50_p4 = scmp.ge.s32.totalorder %s1245_s29, 2  ;;  %p160_p6 = scmp.eq.s32.totalorder %s1223_s27, 7 }
  0x10   : > { %p689_p7 = scmp.ge.s32.totalorder %s960_s25, 1  ;;  %p270_p9 = scmp.lt.s32.totalorder %s960_s25, 9 }
  0x11   : > { %s1247_s29 = smov (%p50_p4, %s1245_s29), 0  ;;  %p1063_p8 = por %p160_p6, %p159_p5 }
  0x12   : > { %s136_s8 = ssub.s32 %s956_s24, %s1247_s29  ;;  %s143_s9 = sadd.s32 1, %s940_s20 }
  0x13   : > { %s138_s10 = sor.u32 %s137_s30, %s136_s8  ;;  %p271_p10 = pnand %p689_p7, %p270_p9 }
  0x14   : > { %p141_p11 = scmp.eq.s32.totalorder %s138_s10, 0  ;;  %p336_p12 = scmp.lt.s32.totalorder (!%p271_p10), %s944_s21, 3 }
  0x15   : > { %274 = sbr.rel (%p271_p10) target bundleno = 397 (0x18d), region = 32  ;;  %p325_p13 = scmp.lt.s32.totalorder (!%p271_p10), %s948_s22, 1 }
  0x16   : > { %s1072_s11 = scalar_select %p141_p11, %s940_s20, %s143_s9  }
  0x17   : > { %s1229_s0 = sld [smem:[#allocation10_spill]] (!%p271_p10)  ;;  %s965_s16 = smov (!%p271_p10), [#allocation3]  }
  0x1a   : > { %vm353_vm0 = vcmask 195584   ;;  %v962_v0 = vmov 0.0   ;;  %vm963_vm1 = vmmov 0   ;;  %s337_s12 = scalar_select %p336_p12, %s944_s21, 3  ;;  %vm374_vm2 = vcmask 261120  }
  0x1b   : > { %354 = vst.msk [vmem:[#allocation2] sm:$0xff] %vm353_vm0, %v962_v0  ;;  %717 = vmatprep.subr.bf16.mxu0 %v962_v0  ;;  %721 = vmatprep.mubr.msk.bf16.mxu0 %vm963_vm1, %v962_v0  ;;  %s326_s13 = scalar_select %p325_p13, %s948_s22, 1  ;;  %vm434_vm3 = vcmask 60416  }
  0x1c   : > { %s712_s14 = sshll.u32 %s337_s12, 4 }
  0x1d   : > { %s343_s17 = scalar_lea.vmem %s1218_s1, %s712_s14  ;;  %s693_s30 = sshll.u32 %s326_s13, 3 }
  0x1e   : > { %v810_v1 = vld [vmem:[%s343_s17 + $0x8] sm:$0xff]   ;;  %s334_s10 = scalar_lea.vmem %s1229_s0, %s693_s30  ;;  %v811_v2 = vld [vmem:[%s343_s17] sm:$0xff]   ;;  %s308_s13 = sand.u32 1, %s936_s19  }
  0x1f   : > { %718 = vmatpush3.bf16.msra.mxu0 %v810_v1  ;;  %v356_v3 = vld [vmem:[%s334_s10] sm:$0xff]  ;;  %s704_s14 = sshll.u32 %s948_s22, 2  ;;  %s347_s17 = scalar_lea.vmem %s1219_s2, %s337_s12 }
  0x20   : > { %719 = vmatprep.subr.bf16.mxu0 %v962_v0  ;;  %v357_v4 = vpack.c.bf16 %v356_v3, %v356_v3  ;;  %s1091_s30 = sshll.u32 %s308_s13, 2  ;;  %s470_s8 = sadd.s32 %s944_s21, %s704_s14  ;;  %v699_v11 = vld [vmem:[%s347_s17] ss:$0 sm:$0xff] }
  0x21   : > { %s1094_s9 = sshll.u32 %s470_s8, 6  ;;  %s310_s10 = scalar_lea.vmem [#allocation3], %s1091_s30 }
  0x22   : > { %v355_v5 = vld [vmem:[#allocation2] sm:$0xff]  ;;  %s474_s27 = sshll.u32 %s310_s10, 4  ;;  %s1101_s12 = scalar_lea.hbm %s1220_s3, %s1094_s9  ;;  %s1103_s27 = int_to_ptr.vmem [resolvable:$true] %s474_s27 }
  0x23   : > { %720 = vmatpush3.bf16.msra.mxu0 %v811_v2  ;;  %s964_s21 = smov 120   ;;  %s448_s14 = scalar_lea.sflag [#allocation4], %s308_s13 }
  0x24   : > { %s812_s15 = scalar_lea.vmem %s1103_s27, 64  ;;  %s816_s17 = sshll.u32 %s965_s16, 4  ;;  %s817_s17 = int_to_ptr.vmem [resolvable:$false] %s816_s17 }
  0x25   : > { %p813_p0 = scmp.ne.s32.totalorder %s1103_s27, %s812_s15  ;;  %s818_s26 = scalar_lea.vmem %s817_s17, 128 }
  0x26   : > { %722 = vmatmul.mubr.msk.bf16.vlgmr.msra.gmra.mxu0 %vm374_vm2, %v357_v4  ;;  %p819_p4 = scmp.lt.s32.totalorder %s1103_s27, %s817_s17  ;;  %p820_p5 = scmp.lt.s32.totalorder %s818_s26, %s812_s15 }
  0x27   : > { %p814_p1 = pnand %p813_p0, %p1052_p3 }
  0x28   : > { %p821_p6 = por %p820_p5, %p819_p4 }
  0x29   : > { %p815_p2 = pneg %p814_p1 }
  0x2b   : > { %p822_p7 = pnand %p821_p6, %p815_p2 }
  0xe6   : > { %v412_v6 = vpop.f32.mrf.mxu0 }
  0xe7   : > { %v418_v7 = vadd.f32 %v412_v6, %v355_v5 }
  0xe8   : > { %v723_v8 = vpop.f32.mrf.mxu0 }
  0xe9   : > { %420 = vst.msk [vmem:[#allocation2] sm:$0xff] %vm353_vm0, %v418_v7 }
  0xea   : > { %v415_v9 = vpop.f32.mrf.mxu0 }
  0xec   : > { %v724_v10 = vpop.f32.mrf.mxu0 }
  0xf0   : > { %v424_v12 = vld [vmem:[#allocation2] sm:$0xff] }
  0xf1   : > { %v432_v13 = vadd.f32 %v699_v11, %v424_v12 }
  0xf3   : > { %v433_v14 = vpack.c.bf16 %v432_v13, %v432_v13 }
  0xf5   : > { %439 = vrot.lane.b32.xlu0 %v433_v14, %s964_s21  ;;  %435 = vst.msk [vmem:[%s310_s10] sm:$0xf] %vm434_vm3, %v433_v14 }
  0xf6   : > { %825 = shalt.err (!%p822_p7)
}
  0xf7   : > { %s826_s8 = scalar_lea.hbm %s1101_s12, 64  ;;  %s830_s22 = scalar_lea.hbm %s1220_s3, 512 }
  0xf8   : > { %p827_p9 = scmp.ne.s32.totalorder %s1101_s12, %s826_s8  ;;  %p831_p12 = scmp.lt.s32.totalorder %s1101_s12, %s1220_s3 }
  0xf9   : > { %p832_p13 = scmp.lt.s32.totalorder %s830_s22, %s826_s8 }
  0xfa   : > { %p828_p10 = pnand %p827_p9, %p1052_p3 }
  0xfb   : > { %p833_p0 = por %p832_p13, %p831_p12 }
  0xfc   : > { %p829_p11 = pneg %p828_p10 }
  0xfe   : > { %p834_p1 = pnand %p833_p0, %p829_p11 }
 0x100   : > { %837 = shalt.err (!%p834_p1)
}
 0x101   : > { %725 = dma.vmem_to_hbm [thread:$0]  (%p1052_p3), %s1103_s27, 64, %s1101_s12, %s448_s14  }
 0x102   : > { %s966_s15 = smov 112   ;;  %s1230_s17 = sadd.s32 4294967295, %s960_s25  }
 0x103   : > { %443 = vrot.lane.b32.xlu0 %v433_v14, %s966_s15  ;;  %s1128_s26 = sand.u32 1, %s1230_s17   ;;  %s317_s8 = scalar_lea.vmem [#allocation5], %s1091_s30 }
 0x104   : > { %s490_s13 = sshll.u32 %s317_s8, 4  ;;  %s1135_s21 = scalar_lea.hbm %s1221_s4, %s1094_s9  ;;  %s1137_s13 = int_to_ptr.vmem [resolvable:$true] %s490_s13 }
 0x105   : > { %s1225_s27 = scalar_lea.vmem [#allocation7], %s1091_s30  ;;  %s838_s16 = scalar_lea.vmem %s1137_s13, 64 }
 0x106   : > { %s506_s12 = sshll.u32 %s1225_s27, 4  ;;  %p839_p2 = scmp.ne.s32.totalorder %s1137_s13, %s838_s16  ;;  %s507_s12 = int_to_ptr.vmem [resolvable:$true] %s506_s12 }
 0x107   : > { %s967_s15 = smov [#allocation5]  }
 0x108   : > { %p840_p4 = pnand %p839_p2, %p1052_p3  ;;  %s842_s17 = sshll.u32 %s967_s15, 4  ;;  %s843_s17 = int_to_ptr.vmem [resolvable:$false] %s842_s17 }
 0x109   : > { %s844_s10 = scalar_lea.vmem %s843_s17, 128  ;;  %p845_p6 = scmp.lt.s32.totalorder %s1137_s13, %s843_s17 }
 0x10a   : > { %p841_p5 = pneg %p840_p4  ;;  %p846_p7 = scmp.lt.s32.totalorder %s844_s10, %s838_s16 }
 0x10c   : > { %p847_p9 = por %p846_p7, %p845_p6 }
 0x10e   : > { %p848_p10 = pnand %p847_p9, %p841_p5 }
 0x167   : > { %v440_v15 = vpop.permute.xlu0 %439 }
 0x168   : > { %442 = vst.msk [vmem:[%s317_s8] sm:$0xf] %vm434_vm3, %v440_v15 }
 0x169   : > { %851 = shalt.err (!%p848_p10)
}
 0x16a   : > { %s852_s8 = scalar_lea.hbm %s1135_s21, 64  ;;  %s856_s15 = scalar_lea.hbm %s1221_s4, 512 }
 0x16b   : > { %p853_p11 = scmp.ne.s32.totalorder %s1135_s21, %s852_s8  ;;  %p857_p0 = scmp.lt.s32.totalorder %s1135_s21, %s1221_s4 }
 0x16c   : > { %p858_p1 = scmp.lt.s32.totalorder %s856_s15, %s852_s8 }
 0x16d   : > { %p854_p12 = pnand %p853_p11, %p1052_p3 }
 0x16e   : > { %p859_p2 = por %p858_p1, %p857_p0 }
 0x16f   : > { %p855_p13 = pneg %p854_p12 }
 0x171   : > { %p860_p4 = pnand %p859_p2, %p855_p13 }
 0x173   : > { %863 = shalt.err (!%p860_p4)
}
 0x174   : > { %s1231_s16 = scalar_lea.sflag [#allocation6], %s1128_s26  ;;  %s504_s0 = scalar_lea.hbm %s1222_s5, %s1094_s9 }
 0x175   : > { %726 = dma.vmem_to_hbm [thread:$0]  (%p1052_p3), %s1137_s13, 64, %s1135_s21, %s1231_s16   ;;  %v444_v16 = vpop.permute.xlu0 %443 }
 0x176   : > { %s1232_s14 = scalar_lea.vmem [#allocation7], %s1091_s30  ;;  %s864_s10 = scalar_lea.vmem %s507_s12, 64 }
 0x177   : > { %446 = vst.msk [vmem:[%s1232_s14] sm:$0xf] %vm434_vm3, %v444_v16  ;;  %p865_p5 = scmp.ne.s32.totalorder %s507_s12, %s864_s10  ;;  %s968_s8 = smov [#allocation7]  }
 0x178   : > { %s868_s22 = sshll.u32 %s968_s8, 4  ;;  %s869_s22 = int_to_ptr.vmem [resolvable:$false] %s868_s22 }
 0x179   : > { %p866_p6 = pnand %p865_p5, %p1052_p3  ;;  %s870_s15 = scalar_lea.vmem %s869_s22, 128 }
 0x17a   : > { %p871_p9 = scmp.lt.s32.totalorder %s507_s12, %s869_s22  ;;  %p872_p10 = scmp.lt.s32.totalorder %s870_s15, %s864_s10 }
 0x17b   : > { %p867_p7 = pneg %p866_p6 }
 0x17c   : > { %p873_p11 = por %p872_p10, %p871_p9 }
 0x17e   : > { %p874_p12 = pnand %p873_p11, %p867_p7 }
 0x180   : > { %877 = shalt.err (!%p874_p12)
}
 0x181   : > { %s878_s13 = scalar_lea.hbm %s504_s0, 64  ;;  %s882_s21 = scalar_lea.hbm %s1222_s5, 512 }
 0x182   : > { %p879_p13 = scmp.ne.s32.totalorder %s504_s0, %s878_s13  ;;  %p883_p2 = scmp.lt.s32.totalorder %s504_s0, %s1222_s5 }
 0x183   : > { %p884_p4 = scmp.lt.s32.totalorder %s882_s21, %s878_s13 }
 0x184   : > { %p880_p0 = pnand %p879_p13, %p1052_p3 }
 0x185   : > { %p885_p5 = por %p884_p4, %p883_p2 }
 0x186   : > { %p881_p1 = pneg %p880_p0 }
 0x188   : > { %p886_p6 = pnand %p885_p5, %p881_p1 }
 0x18a   : > { %889 = shalt.err (!%p886_p6)
}
 0x18b   : > { %s1233_s17 = scalar_lea.sflag [#allocation6], %s1128_s26 }
 0x18c   : > { %727 = dma.vmem_to_hbm [thread:$0]  (%p1052_p3), %s507_s12, 64, %s504_s0, %s1233_s17  }
 0x18d PF: > { %p741_p7 = scmp.ge.s32.totalorder %s960_s25, 2  ;;  %s518_s14 = sand.u32 1, %s932_s18  }
 0x18e   : > { %s519_s10 = scalar_lea.sflag [#allocation4], %s518_s14 }
 0x18f   : > { %p732_p9 = pnand %p741_p7, %p1063_p8 }
 0x191   : > { %p733_p10 = pneg %p732_p9 }
 0x193   : > { %923 = dma.done.wait (%p733_p10), %s519_s10, 64  }
 0x194   : > { %925 = vsyncadd (%p733_p10), %s519_s10, 4294967232  ;;  %s1234_s8 = sadd.s32 4294967294, %s960_s25  }
 0x195   : > { %s527_s22 = sand.u32 1, %s1234_s8  }
 0x196   : > { %s528_s15 = scalar_lea.sflag [#allocation6], %s527_s22 }
 0x197   : > { %927 = dma.done.wait (%p733_p10), %s528_s15, 128  }
 0x198   : > { %929 = vsyncadd (%p733_p10), %s528_s15, 4294967168  ;;  %s22_s25 = sadd.s32 1, %s960_s25   ;;  %s1235_s18 = smov %s936_s19 }
 0x199   : > { %p19_p3 = scmp.ge.s32.totalorder %s22_s25, 10   ;;  %s1236_s19 = smov %s940_s20 }
 0x19a   : > { %s1237_s20 = smov %s1072_s11  ;;  %s1238_s21 = smov %s952_s23 }
 0x19b   : > { %s1239_s22 = smov %s956_s24  ;;  %s1240_s23 = smov %s1243_s28 }
 0x19c   : > { %s1241_s24 = smov %s1247_s29  ;;  %21 = sbr.rel (!%p19_p3) target bundleno = 9 (0x9), region = 113 }
 0x1a1   :  { %542 = vsyncpa [#allocation4], 1 }
 0x1a2   :  { %544 = vsyncpa [#allocation4 + $0x1], 1 }
 0x1a3   :  { %545 = vsyncpa [#allocation6], 1 }
 0x1a4   :  { %547 = vsyncpa [#allocation6 + $0x1], 1 }

</bundles_post_ra>
